<compile_context>
chip_gen: v6e
topology: v6e:2x2x1
jax: 0.10.0
libtpu: 0.0.40
codegen_flags: <defaults>
</compile_context>

<pallas_src>
import functools

import jax
import jax.numpy as jnp
from jax.experimental import pallas as pl
from jax.experimental.pallas import tpu as pltpu


def _erf_approx(x):
    # Abramowitz & Stegun 7.1.26, max abs error ~1.5e-7 (exp + reciprocal -> EUP).
    a1, a2, a3, a4, a5 = 0.254829592, -0.284496736, 1.421413741, -1.453152027, 1.061405429
    p = 0.3275911
    sign = jnp.where(x >= 0.0, 1.0, -1.0)
    ax = jnp.abs(x)
    t = pl.reciprocal(1.0 + p * ax, approx=True)
    poly = ((((a5 * t + a4) * t + a3) * t + a2) * t + a1) * t
    return sign * (1.0 - poly * jnp.exp(-ax * ax))


def _gelu_exact(x):
    # PyTorch nn.GELU default (erf-based).
    return 0.5 * x * (1.0 + _erf_approx(x * 0.7071067811865476))


def _layer_norm(x, gamma, beta, eps):
    mu = jnp.mean(x, axis=-1, keepdims=True)
    var = jnp.mean((x - mu) ** 2, axis=-1, keepdims=True)
    return (x - mu) * jax.lax.rsqrt(var + eps) * gamma + beta


def _block_kernel(x_ref, g1_ref, b1_ref, wqkv_ref, wproj_ref, bproj_ref,
                  g2_ref, b2_ref, w1_ref, bf1_ref, w2_ref, bf2_ref,
                  out_ref, attn_out_ref, o_scratch,
                  *, num_heads, head_dim, heads_per_group, eps):
    bt, n, c = x_ref.shape            # (batch_tile, tokens, channels)
    m = bt * n                        # flattened M for the big matmuls
    gw = heads_per_group * head_dim   # lane width handled per head-group
    n_groups = num_heads // heads_per_group

    # Inputs arrive bf16; LN / softmax / residual math is done in f32 registers.
    x = x_ref[...].astype(jnp.float32).reshape(m, c)           # (M, C) f32

    # ---------------- LayerNorm 1 ----------------
    h_bf = _layer_norm(x, g1_ref[...], b1_ref[...], eps).astype(jnp.bfloat16)

    # ---------------- qkv projection (single large-M, full-K MXU matmul) ----
    # Softmax scale is pre-folded into the q columns of wqkv (wrapper), so the
    # result can be cast to bf16 exactly once; the transient f32 slab is not
    # kept live across the attention loop (halves its VMEM/vld footprint).
    qkv = jnp.dot(h_bf, wqkv_ref[...], preferred_element_type=jnp.float32)
    qkv_bf = qkv.astype(jnp.bfloat16).reshape(bt, n, 3 * c)     # (bt, N, 3C) bf16

    if heads_per_group > 1:
        # within-group lane index, hoisted out of the loops (same for every grp)
        lane = jax.lax.broadcasted_iota(jnp.int32, (bt, n, gw), 2)

    # ---------------- attention over 128-lane-aligned head groups -----------
    # Every qkv slice and every o_scratch store below is gw lanes wide at a
    # gw-aligned offset (gw == 128 for head_dim == 64), so loads are aligned and
    # stores are lane-dense (no masked vst). Heads inside a group are isolated
    # by zero-masking the other heads' lanes of q and v (exact; no extra MXU
    # passes since K, N per matmul stay within one MXU tile).
    # TODO(synk): for very large head counts, stage qkv in VMEM scratch and use
    # lax.fori_loop here to bound live ranges instead of the static unroll.
    for grp in range(n_groups):
        lo = grp * gw
        qg = qkv_bf[:, :, lo:lo + gw]                           # (bt, N, gw)
        kg = qkv_bf[:, :, c + lo:c + lo + gw]
        vg = qkv_bf[:, :, 2 * c + lo:2 * c + lo + gw]

        o_grp = jnp.zeros((bt, n, gw), jnp.float32)
        for j in range(heads_per_group):
            if heads_per_group == 1:
                qh, vh = qg, vg
            else:
                msk = (lane >= j * head_dim) & (lane < (j + 1) * head_dim)
                qh = jnp.where(msk, qg, 0)
                vh = jnp.where(msk, vg, 0)

            s = jnp.einsum('bqd,bkd->bqk', qh, kg,
                           preferred_element_type=jnp.float32)   # (bt, N, N) f32
            s = s - jnp.max(s, axis=-1, keepdims=True)
            p = jnp.exp(s)
            # approx reciprocal -> EUP slot; ~1e-3-class error on the softmax
            # normalization, well inside the bf16-level output tolerance.
            p = p * pl.reciprocal(jnp.sum(p, axis=-1, keepdims=True), approx=True)

            o_grp = o_grp + jnp.einsum('bqk,bkd->bqd',
                                       p.astype(jnp.bfloat16), vh,
                                       preferred_element_type=jnp.float32)

        # lane-dense, gw-aligned store into the bf16 scratch
        o_scratch[:, lo:lo + gw] = o_grp.reshape(m, gw).astype(jnp.bfloat16)

    # ---------------- output projection (full-K matmul) ---------------------
    attn_out = jnp.dot(o_scratch[...], wproj_ref[...],
                       preferred_element_type=jnp.float32) + bproj_ref[...]   # (M, C) f32
    attn_out_ref[...] = attn_out.reshape(bt, n, c).astype(attn_out_ref.dtype)

    # ---------------- residual 1 ---------------------------------------------
    x1 = x + attn_out                                                          # (M, C) f32

    # ---------------- LayerNorm 2 + MLP --------------------------------------
    h2 = _layer_norm(x1, g2_ref[...], b2_ref[...], eps).astype(jnp.bfloat16)
    fc1 = jnp.dot(h2, w1_ref[...], preferred_element_type=jnp.float32) + bf1_ref[...]
    act = _gelu_exact(fc1).astype(jnp.bfloat16)
    fc2 = jnp.dot(act, w2_ref[...], preferred_element_type=jnp.float32) + bf2_ref[...]

    out_ref[...] = (x1 + fc2).reshape(bt, n, c).astype(out_ref.dtype)


def _tpu_vmem_capacity_bytes():
    try:
        return int(pltpu.get_tpu_info().vmem_capacity_bytes)
    except Exception:
        return 64 * 1024 * 1024   # conservative (v7x-sized) fallback


def _pick_batch_tile(batch, tokens, vmem_cap_bytes):
    """Largest divisor of `batch` with bt*N ~ target rows, keeping >=2 grid steps."""
    # Bigger tiles amortize the ~0.35us/step overhead and improve MXU fill;
    # v7x (64 MiB VMEM) gets a smaller target than v5e/v6e (128 MiB).
    target_rows = 384 if vmem_cap_bytes <= 64 * 1024 * 1024 else 1024
    bt = max(1, min(batch, max(1, target_rows // max(tokens, 1))))
    while batch % bt:
        bt -= 1
    # Keep at least 2 (ideally even) grid steps so the "parallel" batch axis can
    # shard across both TensorCores on v7x megacore.
    if batch // bt < 2 and batch >= 2:
        bt = max(1, batch // 2)
        while batch % bt:
            bt -= 1
    return bt


def _pick_heads_per_group(num_heads, head_dim):
    """Heads per group so the group's lane width is 128 where the shape allows."""
    if head_dim % 128 == 0:
        return 1                      # already lane-aligned per head
    if 128 % head_dim == 0:
        hpg = min(num_heads, 128 // head_dim)
        while num_heads % hpg:
            hpg -= 1
        return max(hpg, 1)
    return 1                          # irregular head_dim: fall back to per-head


def block_forward(x, params, num_heads, *, batch_tile=None, out_dtype=jnp.bfloat16):
    B, N, C = x.shape
    assert C % num_heads == 0
    head_dim = C // num_heads
    scale = head_dim ** (-0.5)
    hidden = params["w1"].shape[1]

    vmem_cap = _tpu_vmem_capacity_bytes()
    bt = batch_tile or _pick_batch_tile(B, N, vmem_cap)
    assert B % bt == 0
    heads_per_group = _pick_heads_per_group(num_heads, head_dim)

    kernel = functools.partial(_block_kernel, num_heads=num_heads,
                               head_dim=head_dim,
                               heads_per_group=heads_per_group, eps=1e-5)

    def rep(shape):
        # Constant-index blocks (weights / biases / LN params): single-buffered.
        # They never change across the batch grid, so double-buffering would
        # only duplicate them in VMEM with zero pipelining benefit.
        nd = len(shape)
        return pl.BlockSpec(shape, lambda i, _nd=nd: (0,) * _nd,
                            pipeline_mode=pl.Buffered(1))

    x_spec = pl.BlockSpec((bt, N, C), lambda i: (i, 0, 0))
    out_spec = pl.BlockSpec((bt, N, C), lambda i: (i, 0, 0))

    in_specs = [
        x_spec,                                         # x (batch tile, bf16)
        rep((1, C)), rep((1, C)),                       # norm1 gamma / beta
        rep((C, 3 * C)),                                # qkv weight (bf16, scale folded into q)
        rep((C, C)), rep((1, C)),                       # proj weight (bf16) / bias
        rep((1, C)), rep((1, C)),                       # norm2 gamma / beta
        rep((C, hidden)), rep((1, hidden)),             # fc1 weight (bf16) / bias
        rep((hidden, C)), rep((1, C)),                  # fc2 weight (bf16) / bias
    ]

    f32 = lambda a: a.astype(jnp.float32)
    bf16 = lambda a: a.astype(jnp.bfloat16)

    # Fold the softmax scale into the q columns of the qkv weight (free in-kernel).
    wqkv = f32(params["wqkv"]).at[:, :C].multiply(scale)

    return pl.pallas_call(
        kernel,
        out_shape=(jax.ShapeDtypeStruct((B, N, C), out_dtype),
                   jax.ShapeDtypeStruct((B, N, C), out_dtype)),
        grid_spec=pltpu.PrefetchScalarGridSpec(
            num_scalar_prefetch=0,
            grid=(B // bt,),
            in_specs=in_specs,
            out_specs=(out_spec, out_spec),
            scratch_shapes=[pltpu.VMEM((bt * N, C), jnp.bfloat16)],
        ),
        compiler_params=pltpu.CompilerParams(
            dimension_semantics=("parallel",),
            # ~48 MiB on v7x (64 MiB physical), ~96 MiB on v5e/v6e (128 MiB):
            # leave headroom for Mosaic-internal scratch instead of a hard 64 MiB.
            vmem_limit_bytes=int(vmem_cap * 3 // 4),
        ),
    )(bf16(x),
      f32(params["g1"]), f32(params["b1"]),
      bf16(wqkv),
      bf16(params["wproj"]), f32(params["bproj"]),
      f32(params["g2"]), f32(params["b2"]),
      bf16(params["w1"]), f32(params["bf1"]),
      bf16(params["w2"]), f32(params["bf2"]))


def block_reference(x, params, num_heads):
    """Pure-JAX f32 reference mirroring the PyTorch forward (BSM skipped)."""
    B, N, C = x.shape
    hd = C // num_heads
    scale = hd ** (-0.5)

    def ln(z, g, b):
        mu = jnp.mean(z, -1, keepdims=True)
        var = jnp.mean((z - mu) ** 2, -1, keepdims=True)
        return (z - mu) * jax.lax.rsqrt(var + 1e-5) * g + b

    h = ln(x, params["g1"][0], params["b1"][0])
    qkv = h @ params["wqkv"]                                    # (B, N, 3C)
    qkv = qkv.reshape(B, N, 3, num_heads, hd).transpose(2, 0, 3, 1, 4)
    q, k, v = qkv[0], qkv[1], qkv[2]
    attn = jnp.einsum('bhqd,bhkd->bhqk', q, k) * scale
    attn = jax.nn.softmax(attn, axis=-1)
    o = jnp.einsum('bhqk,bhkd->bhqd', attn, v).transpose(0, 2, 1, 3).reshape(B, N, C)
    attn_out = o @ params["wproj"] + params["bproj"][0]
    x1 = x + attn_out
    h2 = ln(x1, params["g2"][0], params["b2"][0])
    m = jax.nn.gelu(h2 @ params["w1"] + params["bf1"][0], approximate=False)
    m = m @ params["w2"] + params["bf2"][0]
    return x1 + m, attn_out


def init_params(key, dim, mlp_ratio=4.0):
    hidden = int(dim * mlp_ratio)
    ks = jax.random.split(key, 6)
    return {
        "g1": jnp.ones((1, dim), jnp.float32),
        "b1": jnp.zeros((1, dim), jnp.float32),
        "wqkv": 0.02 * jax.random.normal(ks[0], (dim, 3 * dim), jnp.float32),
        "wproj": 0.02 * jax.random.normal(ks[1], (dim, dim), jnp.float32),
        "bproj": 0.02 * jax.random.normal(ks[2], (1, dim), jnp.float32),
        "g2": jnp.ones((1, dim), jnp.float32),
        "b2": jnp.zeros((1, dim), jnp.float32),
        "w1": 0.02 * jax.random.normal(ks[3], (dim, hidden), jnp.float32),
        "bf1": 0.02 * jax.random.normal(ks[4], (1, hidden), jnp.float32),
        "w2": 0.02 * jax.random.normal(ks[5], (hidden, dim), jnp.float32),
        "bf2": jnp.zeros((1, dim), jnp.float32),
    }


if __name__ == "__main__":
    B, N, C = 2, 8, 32
    NUM_HEADS = 4

    key = jax.random.PRNGKey(0)
    kx, kp = jax.random.split(key)
    x = jax.random.normal(kx, (B, N, C), jnp.float32)
    params = init_params(kp, C)

    # Feed the kernel bf16 activations (halves the x input DMA); compare against
    # an f32 reference computed from the same bf16-rounded input.
    x_bf = x.astype(jnp.bfloat16)
    out, attn_out = block_forward(x_bf, params, NUM_HEADS)
    out = jax.block_until_ready(out)
    attn_out = jax.block_until_ready(attn_out)

    ref_out, ref_attn = block_reference(x_bf.astype(jnp.float32), params, NUM_HEADS)
    # bf16 MXU inputs / bf16 outputs (f32 accumulation) vs f32 reference.
    assert jnp.allclose(out.astype(jnp.float32), ref_out,
                        rtol=2e-2, atol=2e-2), "output mismatch"
    assert jnp.allclose(attn_out.astype(jnp.float32), ref_attn,
                        rtol=2e-2, atol=2e-2), "attn_output mismatch"

    print("KERNEL_OK")
</pallas_src>

<mosaic_0001>
module attributes {stable_mosaic.version = 11 : i64} {
  func.func @_block_kernel(%arg0: i32, %arg1: memref<1x8x32xbf16, #tpu.memory_space<vmem>>, %arg2: memref<1x32xf32, #tpu.memory_space<vmem>>, %arg3: memref<1x32xf32, #tpu.memory_space<vmem>>, %arg4: memref<32x96xbf16, #tpu.memory_space<vmem>>, %arg5: memref<32x32xbf16, #tpu.memory_space<vmem>>, %arg6: memref<1x32xf32, #tpu.memory_space<vmem>>, %arg7: memref<1x32xf32, #tpu.memory_space<vmem>>, %arg8: memref<1x32xf32, #tpu.memory_space<vmem>>, %arg9: memref<32x128xbf16, #tpu.memory_space<vmem>>, %arg10: memref<1x128xf32, #tpu.memory_space<vmem>>, %arg11: memref<128x32xbf16, #tpu.memory_space<vmem>>, %arg12: memref<1x32xf32, #tpu.memory_space<vmem>>, %arg13: memref<1x8x32xbf16, #tpu.memory_space<vmem>>, %arg14: memref<1x8x32xbf16, #tpu.memory_space<vmem>>, %arg15: memref<8x32xbf16, #tpu.memory_space<vmem>>) attributes {dimension_semantics = [#tpu.dimension_semantics<parallel>], iteration_bounds = array<i64: 2>, scalar_prefetch = 0 : i64, scratch_operands = 1 : i64, tpu.core_type = #tpu.core_type<tc>, window_params = [{transform_indices = @transform_0, window_bounds = array<i64: 1, 8, 32>}, {pipeline_mode = #tpu.pipeline_mode<synchronous>, transform_indices = @transform_1, window_bounds = array<i64: 1, 32>}, {pipeline_mode = #tpu.pipeline_mode<synchronous>, transform_indices = @transform_2, window_bounds = array<i64: 1, 32>}, {pipeline_mode = #tpu.pipeline_mode<synchronous>, transform_indices = @transform_3, window_bounds = array<i64: 32, 96>}, {pipeline_mode = #tpu.pipeline_mode<synchronous>, transform_indices = @transform_4, window_bounds = array<i64: 32, 32>}, {pipeline_mode = #tpu.pipeline_mode<synchronous>, transform_indices = @transform_5, window_bounds = array<i64: 1, 32>}, {pipeline_mode = #tpu.pipeline_mode<synchronous>, transform_indices = @transform_6, window_bounds = array<i64: 1, 32>}, {pipeline_mode = #tpu.pipeline_mode<synchronous>, transform_indices = @transform_7, window_bounds = array<i64: 1, 32>}, {pipeline_mode = #tpu.pipeline_mode<synchronous>, transform_indices = @transform_8, window_bounds = array<i64: 32, 128>}, {pipeline_mode = #tpu.pipeline_mode<synchronous>, transform_indices = @transform_9, window_bounds = array<i64: 1, 128>}, {pipeline_mode = #tpu.pipeline_mode<synchronous>, transform_indices = @transform_10, window_bounds = array<i64: 128, 32>}, {pipeline_mode = #tpu.pipeline_mode<synchronous>, transform_indices = @transform_11, window_bounds = array<i64: 1, 32>}, {transform_indices = @transform_12, window_bounds = array<i64: 1, 8, 32>}, {transform_indices = @transform_13, window_bounds = array<i64: 1, 8, 32>}]} {
    %c0 = arith.constant 0 : index
    %c0_0 = arith.constant 0 : index
    %c0_1 = arith.constant 0 : index
    %0 = vector.load %arg1[%c0, %c0_0, %c0_1] : memref<1x8x32xbf16, #tpu.memory_space<vmem>>, vector<1x8x32xbf16>
    %1 = arith.extf %0 : vector<1x8x32xbf16> to vector<1x8x32xf32>
    %2 = vector.shape_cast %1 : vector<1x8x32xf32> to vector<8x32xf32>
    %c0_2 = arith.constant 0 : index
    %c0_3 = arith.constant 0 : index
    %3 = vector.load %arg2[%c0_2, %c0_3] : memref<1x32xf32, #tpu.memory_space<vmem>>, vector<1x32xf32>
    %c0_4 = arith.constant 0 : index
    %c0_5 = arith.constant 0 : index
    %4 = vector.load %arg3[%c0_4, %c0_5] : memref<1x32xf32, #tpu.memory_space<vmem>>, vector<1x32xf32>
    %cst = arith.constant dense<0.000000e+00> : vector<8xf32>
    %5 = vector.multi_reduction <add>, %2, %cst [1] : vector<8x32xf32> to vector<8xf32>
    %6 = vector.shape_cast %5 : vector<8xf32> to vector<8x1xf32>
    %cst_6 = arith.constant 3.200000e+01 : f32
    %7 = vector.broadcast %cst_6 : f32 to vector<8x1xf32>
    %8 = arith.divf %6, %7 : vector<8x1xf32>
    %9 = vector.broadcast %8 : vector<8x1xf32> to vector<8x32xf32>
    %10 = arith.subf %2, %9 : vector<8x32xf32>
    %11 = arith.mulf %10, %10 : vector<8x32xf32>
    %cst_7 = arith.constant dense<0.000000e+00> : vector<8xf32>
    %12 = vector.multi_reduction <add>, %11, %cst_7 [1] : vector<8x32xf32> to vector<8xf32>
    %13 = vector.shape_cast %12 : vector<8xf32> to vector<8x1xf32>
    %cst_8 = arith.constant 3.200000e+01 : f32
    %14 = vector.broadcast %cst_8 : f32 to vector<8x1xf32>
    %15 = arith.divf %13, %14 : vector<8x1xf32>
    %16 = vector.broadcast %8 : vector<8x1xf32> to vector<8x32xf32>
    %17 = arith.subf %2, %16 : vector<8x32xf32>
    %cst_9 = arith.constant 9.99999974E-6 : f32
    %18 = vector.broadcast %cst_9 : f32 to vector<8x1xf32>
    %19 = arith.addf %15, %18 : vector<8x1xf32>
    %20 = math.rsqrt %19 : vector<8x1xf32>
    %21 = vector.broadcast %20 : vector<8x1xf32> to vector<8x32xf32>
    %22 = arith.mulf %17, %21 : vector<8x32xf32>
    %23 = vector.broadcast %3 : vector<1x32xf32> to vector<8x32xf32>
    %24 = arith.mulf %22, %23 : vector<8x32xf32>
    %25 = vector.broadcast %4 : vector<1x32xf32> to vector<8x32xf32>
    %26 = arith.addf %24, %25 : vector<8x32xf32>
    %27 = arith.truncf %26 : vector<8x32xf32> to vector<8x32xbf16>
    %c0_10 = arith.constant 0 : index
    %c0_11 = arith.constant 0 : index
    %28 = vector.load %arg4[%c0_10, %c0_11] : memref<32x96xbf16, #tpu.memory_space<vmem>>, vector<32x96xbf16>
    %cst_12 = arith.constant dense<0.000000e+00> : vector<8x96xf32>
    %29 = tpu.matmul %27, %28, %cst_12 {dimension_numbers = #tpu.dot_dimension_numbers<[1], [0], [0], [1], [0, 0, 1, 1], [], []>} : vector<8x32xbf16>, vector<32x96xbf16>, vector<8x96xf32> -> vector<8x96xf32>
    %30 = arith.truncf %29 : vector<8x96xf32> to vector<8x96xbf16>
    %31 = vector.shape_cast %30 : vector<8x96xbf16> to vector<1x8x96xbf16>
    %32 = tpu.iota {dimensions = array<i32: 2>} : vector<1x8x32xi32>
    %33 = vector.extract_strided_slice %31 {offsets = [0, 0, 0], sizes = [1, 8, 32], strides = [1, 1, 1]} : vector<1x8x96xbf16> to vector<1x8x32xbf16>
    %34 = vector.extract_strided_slice %31 {offsets = [0, 0, 32], sizes = [1, 8, 32], strides = [1, 1, 1]} : vector<1x8x96xbf16> to vector<1x8x32xbf16>
    %35 = vector.extract_strided_slice %31 {offsets = [0, 0, 64], sizes = [1, 8, 32], strides = [1, 1, 1]} : vector<1x8x96xbf16> to vector<1x8x32xbf16>
    %cst_13 = arith.constant 0.000000e+00 : f32
    %36 = vector.broadcast %cst_13 : f32 to vector<1x8x32xf32>
    %c0_i32 = arith.constant 0 : i32
    %37 = vector.broadcast %c0_i32 : i32 to vector<1x8x32xi32>
    %38 = arith.cmpi sge, %32, %37 : vector<1x8x32xi32>
    %c8_i32 = arith.constant 8 : i32
    %39 = vector.broadcast %c8_i32 : i32 to vector<1x8x32xi32>
    %40 = arith.cmpi slt, %32, %39 : vector<1x8x32xi32>
    %41 = arith.andi %38, %40 : vector<1x8x32xi1>
    %c0_i32_14 = arith.constant 0 : i32
    %42 = arith.sitofp %c0_i32_14 : i32 to bf16
    %43 = vector.broadcast %42 : bf16 to vector<1x8x32xbf16>
    %44 = arith.select %41, %33, %43 : vector<1x8x32xi1>, vector<1x8x32xbf16>
    %c0_i32_15 = arith.constant 0 : i32
    %45 = arith.sitofp %c0_i32_15 : i32 to bf16
    %46 = vector.broadcast %45 : bf16 to vector<1x8x32xbf16>
    %47 = arith.select %41, %35, %46 : vector<1x8x32xi1>, vector<1x8x32xbf16>
    "tpu.trace_start"() <{level = 10 : i32, message = "bqd,bkd->bqk"}> : () -> ()
    %cst_16 = arith.constant dense<0.000000e+00> : vector<1x8x8xf32>
    %48 = tpu.matmul %44, %34, %cst_16 {dimension_numbers = #tpu.dot_dimension_numbers<[2], [2], [1], [1], [0, 0, 0, 1, 1, 1], [0], [0]>} : vector<1x8x32xbf16>, vector<1x8x32xbf16>, vector<1x8x8xf32> -> vector<1x8x8xf32>
    "tpu.trace_stop"() : () -> ()
    %cst_17 = arith.constant dense<0xFF800000> : vector<1x8xf32>
    %49 = vector.multi_reduction <maximumf>, %48, %cst_17 [2] : vector<1x8x8xf32> to vector<1x8xf32>
    %50 = vector.shape_cast %49 : vector<1x8xf32> to vector<1x8x1xf32>
    %51 = vector.broadcast %50 : vector<1x8x1xf32> to vector<1x8x8xf32>
    %52 = arith.subf %48, %51 : vector<1x8x8xf32>
    %53 = math.exp %52 : vector<1x8x8xf32>
    %cst_18 = arith.constant dense<0.000000e+00> : vector<1x8xf32>
    %54 = vector.multi_reduction <add>, %53, %cst_18 [2] : vector<1x8x8xf32> to vector<1x8xf32>
    %55 = vector.shape_cast %54 : vector<1x8xf32> to vector<1x8x1xf32>
    %56 = tpu.reciprocal %55 {approx = true} : vector<1x8x1xf32> -> vector<1x8x1xf32>
    %57 = vector.broadcast %56 : vector<1x8x1xf32> to vector<1x8x8xf32>
    %58 = arith.mulf %53, %57 : vector<1x8x8xf32>
    %59 = arith.truncf %58 : vector<1x8x8xf32> to vector<1x8x8xbf16>
    "tpu.trace_start"() <{level = 10 : i32, message = "bqk,bkd->bqd"}> : () -> ()
    %cst_19 = arith.constant dense<0.000000e+00> : vector<1x8x32xf32>
    %60 = tpu.matmul %59, %47, %cst_19 {dimension_numbers = #tpu.dot_dimension_numbers<[2], [1], [1], [2], [0, 0, 0, 1, 1, 2], [0], [0]>} : vector<1x8x8xbf16>, vector<1x8x32xbf16>, vector<1x8x32xf32> -> vector<1x8x32xf32>
    "tpu.trace_stop"() : () -> ()
    %61 = arith.addf %36, %60 : vector<1x8x32xf32>
    %c8_i32_20 = arith.constant 8 : i32
    %62 = vector.broadcast %c8_i32_20 : i32 to vector<1x8x32xi32>
    %63 = arith.cmpi sge, %32, %62 : vector<1x8x32xi32>
    %c16_i32 = arith.constant 16 : i32
    %64 = vector.broadcast %c16_i32 : i32 to vector<1x8x32xi32>
    %65 = arith.cmpi slt, %32, %64 : vector<1x8x32xi32>
    %66 = arith.andi %63, %65 : vector<1x8x32xi1>
    %c0_i32_21 = arith.constant 0 : i32
    %67 = arith.sitofp %c0_i32_21 : i32 to bf16
    %68 = vector.broadcast %67 : bf16 to vector<1x8x32xbf16>
    %69 = arith.select %66, %33, %68 : vector<1x8x32xi1>, vector<1x8x32xbf16>
    %c0_i32_22 = arith.constant 0 : i32
    %70 = arith.sitofp %c0_i32_22 : i32 to bf16
    %71 = vector.broadcast %70 : bf16 to vector<1x8x32xbf16>
    %72 = arith.select %66, %35, %71 : vector<1x8x32xi1>, vector<1x8x32xbf16>
    "tpu.trace_start"() <{level = 10 : i32, message = "bqd,bkd->bqk"}> : () -> ()
    %cst_23 = arith.constant dense<0.000000e+00> : vector<1x8x8xf32>
    %73 = tpu.matmul %69, %34, %cst_23 {dimension_numbers = #tpu.dot_dimension_numbers<[2], [2], [1], [1], [0, 0, 0, 1, 1, 1], [0], [0]>} : vector<1x8x32xbf16>, vector<1x8x32xbf16>, vector<1x8x8xf32> -> vector<1x8x8xf32>
    "tpu.trace_stop"() : () -> ()
    %cst_24 = arith.constant dense<0xFF800000> : vector<1x8xf32>
    %74 = vector.multi_reduction <maximumf>, %73, %cst_24 [2] : vector<1x8x8xf32> to vector<1x8xf32>
    %75 = vector.shape_cast %74 : vector<1x8xf32> to vector<1x8x1xf32>
    %76 = vector.broadcast %75 : vector<1x8x1xf32> to vector<1x8x8xf32>
    %77 = arith.subf %73, %76 : vector<1x8x8xf32>
    %78 = math.exp %77 : vector<1x8x8xf32>
    %cst_25 = arith.constant dense<0.000000e+00> : vector<1x8xf32>
    %79 = vector.multi_reduction <add>, %78, %cst_25 [2] : vector<1x8x8xf32> to vector<1x8xf32>
    %80 = vector.shape_cast %79 : vector<1x8xf32> to vector<1x8x1xf32>
    %81 = tpu.reciprocal %80 {approx = true} : vector<1x8x1xf32> -> vector<1x8x1xf32>
    %82 = vector.broadcast %81 : vector<1x8x1xf32> to vector<1x8x8xf32>
    %83 = arith.mulf %78, %82 : vector<1x8x8xf32>
    %84 = arith.truncf %83 : vector<1x8x8xf32> to vector<1x8x8xbf16>
    "tpu.trace_start"() <{level = 10 : i32, message = "bqk,bkd->bqd"}> : () -> ()
    %cst_26 = arith.constant dense<0.000000e+00> : vector<1x8x32xf32>
    %85 = tpu.matmul %84, %72, %cst_26 {dimension_numbers = #tpu.dot_dimension_numbers<[2], [1], [1], [2], [0, 0, 0, 1, 1, 2], [0], [0]>} : vector<1x8x8xbf16>, vector<1x8x32xbf16>, vector<1x8x32xf32> -> vector<1x8x32xf32>
    "tpu.trace_stop"() : () -> ()
    %86 = arith.addf %61, %85 : vector<1x8x32xf32>
    %c16_i32_27 = arith.constant 16 : i32
    %87 = vector.broadcast %c16_i32_27 : i32 to vector<1x8x32xi32>
    %88 = arith.cmpi sge, %32, %87 : vector<1x8x32xi32>
    %c24_i32 = arith.constant 24 : i32
    %89 = vector.broadcast %c24_i32 : i32 to vector<1x8x32xi32>
    %90 = arith.cmpi slt, %32, %89 : vector<1x8x32xi32>
    %91 = arith.andi %88, %90 : vector<1x8x32xi1>
    %c0_i32_28 = arith.constant 0 : i32
    %92 = arith.sitofp %c0_i32_28 : i32 to bf16
    %93 = vector.broadcast %92 : bf16 to vector<1x8x32xbf16>
    %94 = arith.select %91, %33, %93 : vector<1x8x32xi1>, vector<1x8x32xbf16>
    %c0_i32_29 = arith.constant 0 : i32
    %95 = arith.sitofp %c0_i32_29 : i32 to bf16
    %96 = vector.broadcast %95 : bf16 to vector<1x8x32xbf16>
    %97 = arith.select %91, %35, %96 : vector<1x8x32xi1>, vector<1x8x32xbf16>
    "tpu.trace_start"() <{level = 10 : i32, message = "bqd,bkd->bqk"}> : () -> ()
    %cst_30 = arith.constant dense<0.000000e+00> : vector<1x8x8xf32>
    %98 = tpu.matmul %94, %34, %cst_30 {dimension_numbers = #tpu.dot_dimension_numbers<[2], [2], [1], [1], [0, 0, 0, 1, 1, 1], [0], [0]>} : vector<1x8x32xbf16>, vector<1x8x32xbf16>, vector<1x8x8xf32> -> vector<1x8x8xf32>
    "tpu.trace_stop"() : () -> ()
    %cst_31 = arith.constant dense<0xFF800000> : vector<1x8xf32>
    %99 = vector.multi_reduction <maximumf>, %98, %cst_31 [2] : vector<1x8x8xf32> to vector<1x8xf32>
    %100 = vector.shape_cast %99 : vector<1x8xf32> to vector<1x8x1xf32>
    %101 = vector.broadcast %100 : vector<1x8x1xf32> to vector<1x8x8xf32>
    %102 = arith.subf %98, %101 : vector<1x8x8xf32>
    %103 = math.exp %102 : vector<1x8x8xf32>
    %cst_32 = arith.constant dense<0.000000e+00> : vector<1x8xf32>
    %104 = vector.multi_reduction <add>, %103, %cst_32 [2] : vector<1x8x8xf32> to vector<1x8xf32>
    %105 = vector.shape_cast %104 : vector<1x8xf32> to vector<1x8x1xf32>
    %106 = tpu.reciprocal %105 {approx = true} : vector<1x8x1xf32> -> vector<1x8x1xf32>
    %107 = vector.broadcast %106 : vector<1x8x1xf32> to vector<1x8x8xf32>
    %108 = arith.mulf %103, %107 : vector<1x8x8xf32>
    %109 = arith.truncf %108 : vector<1x8x8xf32> to vector<1x8x8xbf16>
    "tpu.trace_start"() <{level = 10 : i32, message = "bqk,bkd->bqd"}> : () -> ()
    %cst_33 = arith.constant dense<0.000000e+00> : vector<1x8x32xf32>
    %110 = tpu.matmul %109, %97, %cst_33 {dimension_numbers = #tpu.dot_dimension_numbers<[2], [1], [1], [2], [0, 0, 0, 1, 1, 2], [0], [0]>} : vector<1x8x8xbf16>, vector<1x8x32xbf16>, vector<1x8x32xf32> -> vector<1x8x32xf32>
    "tpu.trace_stop"() : () -> ()
    %111 = arith.addf %86, %110 : vector<1x8x32xf32>
    %c24_i32_34 = arith.constant 24 : i32
    %112 = vector.broadcast %c24_i32_34 : i32 to vector<1x8x32xi32>
    %113 = arith.cmpi sge, %32, %112 : vector<1x8x32xi32>
    %c32_i32 = arith.constant 32 : i32
    %114 = vector.broadcast %c32_i32 : i32 to vector<1x8x32xi32>
    %115 = arith.cmpi slt, %32, %114 : vector<1x8x32xi32>
    %116 = arith.andi %113, %115 : vector<1x8x32xi1>
    %c0_i32_35 = arith.constant 0 : i32
    %117 = arith.sitofp %c0_i32_35 : i32 to bf16
    %118 = vector.broadcast %117 : bf16 to vector<1x8x32xbf16>
    %119 = arith.select %116, %33, %118 : vector<1x8x32xi1>, vector<1x8x32xbf16>
    %c0_i32_36 = arith.constant 0 : i32
    %120 = arith.sitofp %c0_i32_36 : i32 to bf16
    %121 = vector.broadcast %120 : bf16 to vector<1x8x32xbf16>
    %122 = arith.select %116, %35, %121 : vector<1x8x32xi1>, vector<1x8x32xbf16>
    "tpu.trace_start"() <{level = 10 : i32, message = "bqd,bkd->bqk"}> : () -> ()
    %cst_37 = arith.constant dense<0.000000e+00> : vector<1x8x8xf32>
    %123 = tpu.matmul %119, %34, %cst_37 {dimension_numbers = #tpu.dot_dimension_numbers<[2], [2], [1], [1], [0, 0, 0, 1, 1, 1], [0], [0]>} : vector<1x8x32xbf16>, vector<1x8x32xbf16>, vector<1x8x8xf32> -> vector<1x8x8xf32>
    "tpu.trace_stop"() : () -> ()
    %cst_38 = arith.constant dense<0xFF800000> : vector<1x8xf32>
    %124 = vector.multi_reduction <maximumf>, %123, %cst_38 [2] : vector<1x8x8xf32> to vector<1x8xf32>
    %125 = vector.shape_cast %124 : vector<1x8xf32> to vector<1x8x1xf32>
    %126 = vector.broadcast %125 : vector<1x8x1xf32> to vector<1x8x8xf32>
    %127 = arith.subf %123, %126 : vector<1x8x8xf32>
    %128 = math.exp %127 : vector<1x8x8xf32>
    %cst_39 = arith.constant dense<0.000000e+00> : vector<1x8xf32>
    %129 = vector.multi_reduction <add>, %128, %cst_39 [2] : vector<1x8x8xf32> to vector<1x8xf32>
    %130 = vector.shape_cast %129 : vector<1x8xf32> to vector<1x8x1xf32>
    %131 = tpu.reciprocal %130 {approx = true} : vector<1x8x1xf32> -> vector<1x8x1xf32>
    %132 = vector.broadcast %131 : vector<1x8x1xf32> to vector<1x8x8xf32>
    %133 = arith.mulf %128, %132 : vector<1x8x8xf32>
    %134 = arith.truncf %133 : vector<1x8x8xf32> to vector<1x8x8xbf16>
    "tpu.trace_start"() <{level = 10 : i32, message = "bqk,bkd->bqd"}> : () -> ()
    %cst_40 = arith.constant dense<0.000000e+00> : vector<1x8x32xf32>
    %135 = tpu.matmul %134, %122, %cst_40 {dimension_numbers = #tpu.dot_dimension_numbers<[2], [1], [1], [2], [0, 0, 0, 1, 1, 2], [0], [0]>} : vector<1x8x8xbf16>, vector<1x8x32xbf16>, vector<1x8x32xf32> -> vector<1x8x32xf32>
    "tpu.trace_stop"() : () -> ()
    %136 = arith.addf %111, %135 : vector<1x8x32xf32>
    %137 = vector.shape_cast %136 : vector<1x8x32xf32> to vector<8x32xf32>
    %138 = arith.truncf %137 : vector<8x32xf32> to vector<8x32xbf16>
    %c0_41 = arith.constant 0 : index
    %c0_42 = arith.constant 0 : index
    %139 = vector.load %arg15[%c0_41, %c0_42] : memref<8x32xbf16, #tpu.memory_space<vmem>>, vector<8x32xbf16>
    tpu.vector_store %arg15[%c0_41, %c0_42], %138 {strides = array<i32>} : memref<8x32xbf16, #tpu.memory_space<vmem>>, vector<8x32xbf16>,
    %c0_43 = arith.constant 0 : index
    %c0_44 = arith.constant 0 : index
    %140 = vector.load %arg15[%c0_43, %c0_44] : memref<8x32xbf16, #tpu.memory_space<vmem>>, vector<8x32xbf16>
    %c0_45 = arith.constant 0 : index
    %c0_46 = arith.constant 0 : index
    %141 = vector.load %arg5[%c0_45, %c0_46] : memref<32x32xbf16, #tpu.memory_space<vmem>>, vector<32x32xbf16>
    %cst_47 = arith.constant dense<0.000000e+00> : vector<8x32xf32>
    %142 = tpu.matmul %140, %141, %cst_47 {dimension_numbers = #tpu.dot_dimension_numbers<[1], [0], [0], [1], [0, 0, 1, 1], [], []>} : vector<8x32xbf16>, vector<32x32xbf16>, vector<8x32xf32> -> vector<8x32xf32>
    %c0_48 = arith.constant 0 : index
    %c0_49 = arith.constant 0 : index
    %143 = vector.load %arg6[%c0_48, %c0_49] : memref<1x32xf32, #tpu.memory_space<vmem>>, vector<1x32xf32>
    %144 = vector.broadcast %143 : vector<1x32xf32> to vector<8x32xf32>
    %145 = arith.addf %142, %144 : vector<8x32xf32>
    %146 = vector.shape_cast %145 : vector<8x32xf32> to vector<1x8x32xf32>
    %147 = arith.truncf %146 : vector<1x8x32xf32> to vector<1x8x32xbf16>
    %c0_50 = arith.constant 0 : index
    %c0_51 = arith.constant 0 : index
    %c0_52 = arith.constant 0 : index
    %148 = vector.load %arg14[%c0_50, %c0_51, %c0_52] : memref<1x8x32xbf16, #tpu.memory_space<vmem>>, vector<1x8x32xbf16>
    tpu.vector_store %arg14[%c0_50, %c0_51, %c0_52], %147 {strides = array<i32>} : memref<1x8x32xbf16, #tpu.memory_space<vmem>>, vector<1x8x32xbf16>,
    %149 = arith.addf %2, %145 : vector<8x32xf32>
    %c0_53 = arith.constant 0 : index
    %c0_54 = arith.constant 0 : index
    %150 = vector.load %arg7[%c0_53, %c0_54] : memref<1x32xf32, #tpu.memory_space<vmem>>, vector<1x32xf32>
    %c0_55 = arith.constant 0 : index
    %c0_56 = arith.constant 0 : index
    %151 = vector.load %arg8[%c0_55, %c0_56] : memref<1x32xf32, #tpu.memory_space<vmem>>, vector<1x32xf32>
    %cst_57 = arith.constant dense<0.000000e+00> : vector<8xf32>
    %152 = vector.multi_reduction <add>, %149, %cst_57 [1] : vector<8x32xf32> to vector<8xf32>
    %153 = vector.shape_cast %152 : vector<8xf32> to vector<8x1xf32>
    %cst_58 = arith.constant 3.200000e+01 : f32
    %154 = vector.broadcast %cst_58 : f32 to vector<8x1xf32>
    %155 = arith.divf %153, %154 : vector<8x1xf32>
    %156 = vector.broadcast %155 : vector<8x1xf32> to vector<8x32xf32>
    %157 = arith.subf %149, %156 : vector<8x32xf32>
    %158 = arith.mulf %157, %157 : vector<8x32xf32>
    %cst_59 = arith.constant dense<0.000000e+00> : vector<8xf32>
    %159 = vector.multi_reduction <add>, %158, %cst_59 [1] : vector<8x32xf32> to vector<8xf32>
    %160 = vector.shape_cast %159 : vector<8xf32> to vector<8x1xf32>
    %cst_60 = arith.constant 3.200000e+01 : f32
    %161 = vector.broadcast %cst_60 : f32 to vector<8x1xf32>
    %162 = arith.divf %160, %161 : vector<8x1xf32>
    %163 = vector.broadcast %155 : vector<8x1xf32> to vector<8x32xf32>
    %164 = arith.subf %149, %163 : vector<8x32xf32>
    %cst_61 = arith.constant 9.99999974E-6 : f32
    %165 = vector.broadcast %cst_61 : f32 to vector<8x1xf32>
    %166 = arith.addf %162, %165 : vector<8x1xf32>
    %167 = math.rsqrt %166 : vector<8x1xf32>
    %168 = vector.broadcast %167 : vector<8x1xf32> to vector<8x32xf32>
    %169 = arith.mulf %164, %168 : vector<8x32xf32>
    %170 = vector.broadcast %150 : vector<1x32xf32> to vector<8x32xf32>
    %171 = arith.mulf %169, %170 : vector<8x32xf32>
    %172 = vector.broadcast %151 : vector<1x32xf32> to vector<8x32xf32>
    %173 = arith.addf %171, %172 : vector<8x32xf32>
    %174 = arith.truncf %173 : vector<8x32xf32> to vector<8x32xbf16>
    %c0_62 = arith.constant 0 : index
    %c0_63 = arith.constant 0 : index
    %175 = vector.load %arg9[%c0_62, %c0_63] : memref<32x128xbf16, #tpu.memory_space<vmem>>, vector<32x128xbf16>
    %cst_64 = arith.constant dense<0.000000e+00> : vector<8x128xf32>
    %176 = tpu.matmul %174, %175, %cst_64 {dimension_numbers = #tpu.dot_dimension_numbers<[1], [0], [0], [1], [0, 0, 1, 1], [], []>} : vector<8x32xbf16>, vector<32x128xbf16>, vector<8x128xf32> -> vector<8x128xf32>
    %c0_65 = arith.constant 0 : index
    %c0_66 = arith.constant 0 : index
    %177 = vector.load %arg10[%c0_65, %c0_66] : memref<1x128xf32, #tpu.memory_space<vmem>>, vector<1x128xf32>
    %178 = vector.broadcast %177 : vector<1x128xf32> to vector<8x128xf32>
    %179 = arith.addf %176, %178 : vector<8x128xf32>
    %cst_67 = arith.constant 5.000000e-01 : f32
    %180 = vector.broadcast %cst_67 : f32 to vector<8x128xf32>
    %181 = arith.mulf %180, %179 : vector<8x128xf32>
    %cst_68 = arith.constant 0.707106769 : f32
    %182 = vector.broadcast %cst_68 : f32 to vector<8x128xf32>
    %183 = arith.mulf %179, %182 : vector<8x128xf32>
    %cst_69 = arith.constant 0.000000e+00 : f32
    %184 = vector.broadcast %cst_69 : f32 to vector<8x128xf32>
    %185 = arith.cmpf oge, %183, %184 : vector<8x128xf32>
    %cst_70 = arith.constant 1.000000e+00 : f32
    %cst_71 = arith.constant -1.000000e+00 : f32
    %186 = vector.broadcast %cst_70 : f32 to vector<8x128xf32>
    %187 = vector.broadcast %cst_71 : f32 to vector<8x128xf32>
    %188 = arith.select %185, %186, %187 : vector<8x128xi1>, vector<8x128xf32>
    %189 = math.absf %183 : vector<8x128xf32>
    %cst_72 = arith.constant 0.327591091 : f32
    %190 = vector.broadcast %cst_72 : f32 to vector<8x128xf32>
    %191 = arith.mulf %190, %189 : vector<8x128xf32>
    %cst_73 = arith.constant 1.000000e+00 : f32
    %192 = vector.broadcast %cst_73 : f32 to vector<8x128xf32>
    %193 = arith.addf %192, %191 : vector<8x128xf32>
    %194 = tpu.reciprocal %193 {approx = true} : vector<8x128xf32> -> vector<8x128xf32>
    %cst_74 = arith.constant 1.06140542 : f32
    %195 = vector.broadcast %cst_74 : f32 to vector<8x128xf32>
    %196 = arith.mulf %195, %194 : vector<8x128xf32>
    %cst_75 = arith.constant -1.45315206 : f32
    %197 = vector.broadcast %cst_75 : f32 to vector<8x128xf32>
    %198 = arith.addf %196, %197 : vector<8x128xf32>
    %199 = arith.mulf %198, %194 : vector<8x128xf32>
    %cst_76 = arith.constant 1.42141378 : f32
    %200 = vector.broadcast %cst_76 : f32 to vector<8x128xf32>
    %201 = arith.addf %199, %200 : vector<8x128xf32>
    %202 = arith.mulf %201, %194 : vector<8x128xf32>
    %cst_77 = arith.constant -0.284496725 : f32
    %203 = vector.broadcast %cst_77 : f32 to vector<8x128xf32>
    %204 = arith.addf %202, %203 : vector<8x128xf32>
    %205 = arith.mulf %204, %194 : vector<8x128xf32>
    %cst_78 = arith.constant 0.254829586 : f32
    %206 = vector.broadcast %cst_78 : f32 to vector<8x128xf32>
    %207 = arith.addf %205, %206 : vector<8x128xf32>
    %208 = arith.mulf %207, %194 : vector<8x128xf32>
    %cst_79 = arith.constant 0.000000e+00 : f32
    %209 = vector.broadcast %cst_79 : f32 to vector<8x128xf32>
    %210 = arith.subf %209, %189 : vector<8x128xf32>
    %211 = arith.mulf %210, %189 : vector<8x128xf32>
    %212 = math.exp %211 : vector<8x128xf32>
    %213 = arith.mulf %208, %212 : vector<8x128xf32>
    %cst_80 = arith.constant 1.000000e+00 : f32
    %214 = vector.broadcast %cst_80 : f32 to vector<8x128xf32>
    %215 = arith.subf %214, %213 : vector<8x128xf32>
    %216 = arith.mulf %188, %215 : vector<8x128xf32>
    %cst_81 = arith.constant 1.000000e+00 : f32
    %217 = vector.broadcast %cst_81 : f32 to vector<8x128xf32>
    %218 = arith.addf %217, %216 : vector<8x128xf32>
    %219 = arith.mulf %181, %218 : vector<8x128xf32>
    %220 = arith.truncf %219 : vector<8x128xf32> to vector<8x128xbf16>
    %c0_82 = arith.constant 0 : index
    %c0_83 = arith.constant 0 : index
    %221 = vector.load %arg11[%c0_82, %c0_83] : memref<128x32xbf16, #tpu.memory_space<vmem>>, vector<128x32xbf16>
    %cst_84 = arith.constant dense<0.000000e+00> : vector<8x32xf32>
    %222 = tpu.matmul %220, %221, %cst_84 {dimension_numbers = #tpu.dot_dimension_numbers<[1], [0], [0], [1], [0, 0, 1, 1], [], []>} : vector<8x128xbf16>, vector<128x32xbf16>, vector<8x32xf32> -> vector<8x32xf32>
    %c0_85 = arith.constant 0 : index
    %c0_86 = arith.constant 0 : index
    %223 = vector.load %arg12[%c0_85, %c0_86] : memref<1x32xf32, #tpu.memory_space<vmem>>, vector<1x32xf32>
    %224 = vector.broadcast %223 : vector<1x32xf32> to vector<8x32xf32>
    %225 = arith.addf %222, %224 : vector<8x32xf32>
    %226 = arith.addf %149, %225 : vector<8x32xf32>
    %227 = vector.shape_cast %226 : vector<8x32xf32> to vector<1x8x32xf32>
    %228 = arith.truncf %227 : vector<1x8x32xf32> to vector<1x8x32xbf16>
    %c0_87 = arith.constant 0 : index
    %c0_88 = arith.constant 0 : index
    %c0_89 = arith.constant 0 : index
    %229 = vector.load %arg13[%c0_87, %c0_88, %c0_89] : memref<1x8x32xbf16, #tpu.memory_space<vmem>>, vector<1x8x32xbf16>
    tpu.vector_store %arg13[%c0_87, %c0_88, %c0_89], %228 {strides = array<i32>} : memref<1x8x32xbf16, #tpu.memory_space<vmem>>, vector<1x8x32xbf16>,
    return
  }
  func.func @transform_0(%arg0: i32) -> (i32, i32, i32) {
    %c0_i32 = arith.constant 0 : i32
    %c0_i32_0 = arith.constant 0 : i32
    %c0_i32_1 = arith.constant 0 : i32
    return %arg0, %c0_i32, %c0_i32_0 : i32, i32, i32
  }
  func.func @transform_1(%arg0: i32) -> (i32, i32) {
    %c0_i32 = arith.constant 0 : i32
    %c0_i32_0 = arith.constant 0 : i32
    %c0_i32_1 = arith.constant 0 : i32
    return %c0_i32, %c0_i32_0 : i32, i32
  }
  func.func @transform_2(%arg0: i32) -> (i32, i32) {
    %c0_i32 = arith.constant 0 : i32
    %c0_i32_0 = arith.constant 0 : i32
    %c0_i32_1 = arith.constant 0 : i32
    return %c0_i32, %c0_i32_0 : i32, i32
  }
  func.func @transform_3(%arg0: i32) -> (i32, i32) {
    %c0_i32 = arith.constant 0 : i32
    %c0_i32_0 = arith.constant 0 : i32
    %c0_i32_1 = arith.constant 0 : i32
    return %c0_i32, %c0_i32_0 : i32, i32
  }
  func.func @transform_4(%arg0: i32) -> (i32, i32) {
    %c0_i32 = arith.constant 0 : i32
    %c0_i32_0 = arith.constant 0 : i32
    %c0_i32_1 = arith.constant 0 : i32
    return %c0_i32, %c0_i32_0 : i32, i32
  }
  func.func @transform_5(%arg0: i32) -> (i32, i32) {
    %c0_i32 = arith.constant 0 : i32
    %c0_i32_0 = arith.constant 0 : i32
    %c0_i32_1 = arith.constant 0 : i32
    return %c0_i32, %c0_i32_0 : i32, i32
  }
  func.func @transform_6(%arg0: i32) -> (i32, i32) {
    %c0_i32 = arith.constant 0 : i32
    %c0_i32_0 = arith.constant 0 : i32
    %c0_i32_1 = arith.constant 0 : i32
    return %c0_i32, %c0_i32_0 : i32, i32
  }
  func.func @transform_7(%arg0: i32) -> (i32, i32) {
    %c0_i32 = arith.constant 0 : i32
    %c0_i32_0 = arith.constant 0 : i32
    %c0_i32_1 = arith.constant 0 : i32
    return %c0_i32, %c0_i32_0 : i32, i32
  }
  func.func @transform_8(%arg0: i32) -> (i32, i32) {
    %c0_i32 = arith.constant 0 : i32
    %c0_i32_0 = arith.constant 0 : i32
    %c0_i32_1 = arith.constant 0 : i32
    return %c0_i32, %c0_i32_0 : i32, i32
  }
  func.func @transform_9(%arg0: i32) -> (i32, i32) {
    %c0_i32 = arith.constant 0 : i32
    %c0_i32_0 = arith.constant 0 : i32
    %c0_i32_1 = arith.constant 0 : i32
    return %c0_i32, %c0_i32_0 : i32, i32
  }
  func.func @transform_10(%arg0: i32) -> (i32, i32) {
    %c0_i32 = arith.constant 0 : i32
    %c0_i32_0 = arith.constant 0 : i32
    %c0_i32_1 = arith.constant 0 : i32
    return %c0_i32, %c0_i32_0 : i32, i32
  }
  func.func @transform_11(%arg0: i32) -> (i32, i32) {
    %c0_i32 = arith.constant 0 : i32
    %c0_i32_0 = arith.constant 0 : i32
    %c0_i32_1 = arith.constant 0 : i32
    return %c0_i32, %c0_i32_0 : i32, i32
  }
  func.func @transform_12(%arg0: i32) -> (i32, i32, i32) {
    %c0_i32 = arith.constant 0 : i32
    %c0_i32_0 = arith.constant 0 : i32
    %c0_i32_1 = arith.constant 0 : i32
    return %arg0, %c0_i32, %c0_i32_0 : i32, i32, i32
  }
  func.func @transform_13(%arg0: i32) -> (i32, i32, i32) {
    %c0_i32 = arith.constant 0 : i32
    %c0_i32_0 = arith.constant 0 : i32
    %c0_i32_1 = arith.constant 0 : i32
    return %arg0, %c0_i32, %c0_i32_0 : i32, i32, i32
  }
}

</mosaic_0001>

<bundles_post_ra>
// kernel: tpu_custom_call.1
= control target key start
LH: loop header
LB: loop body
LE: loop exit
PB: predicated region body
PF: predicated region fallthrough
CT: control target
= control target key end

     0   :  { %s2275_s0 = inlined_call_operand.vmem [shape: bf16[2,8,32], index: 0, kind: input, shape index: {}]   ;;  %s2276_s1 = inlined_call_operand.vmem [shape: f32[1,32], index: 1, kind: input, shape index: {}]   ;;  %s2277_s2 = inlined_call_operand.vmem [shape: f32[1,32], index: 2, kind: input, shape index: {}]   ;;  %s2278_s3 = inlined_call_operand.vmem [shape: bf16[32,96], index: 3, kind: input, shape index: {}]   ;;  %s2279_s4 = inlined_call_operand.vmem [shape: bf16[32,32], index: 4, kind: input, shape index: {}]   ;;  %s2280_s5 = inlined_call_operand.vmem [shape: f32[1,32], index: 5, kind: input, shape index: {}]   ;;  %s2281_s6 = inlined_call_operand.vmem [shape: f32[1,32], index: 6, kind: input, shape index: {}]   ;;  %s2282_s7 = inlined_call_operand.vmem [shape: f32[1,32], index: 7, kind: input, shape index: {}]   ;;  %s2283_s8 = inlined_call_operand.vmem [shape: bf16[32,128], index: 8, kind: input, shape index: {}]   ;;  %s2284_s9 = inlined_call_operand.vmem [shape: f32[1,128], index: 9, kind: input, shape index: {}]   ;;  %s2285_s10 = inlined_call_operand.vmem [shape: bf16[128,32], index: 10, kind: input, shape index: {}]   ;;  %s2286_s11 = inlined_call_operand.vmem [shape: f32[1,32], index: 11, kind: input, shape index: {}]   ;;  %s2287_s12 = inlined_call_operand.hbm [shape: bf16[2,8,32], index: 12, kind: output, shape index: {0}]   ;;  %s2288_s13 = inlined_call_operand.hbm [shape: bf16[2,8,32], index: 13, kind: output, shape index: {1}]  }
   0x1   :  { %2291 = sst [smem:[#allocation9_spill]] %s2275_s0 }
   0x2   :  { %2292 = sst [smem:[#allocation10_spill]] %s2276_s1 }
   0x3   :  { %2293 = sst [smem:[#allocation11_spill]] %s2277_s2 }
   0x4   :  { %2294 = sst [smem:[#allocation12_spill]] %s2278_s3 }
   0x5   :  { %2295 = sst [smem:[#allocation13_spill]] %s2279_s4 }
   0x6   :  { %2296 = sst [smem:[#allocation14_spill]] %s2280_s5 }
   0x7   :  { %19 = vsyncpa [#allocation4], 0 }
   0x8   :  { %21 = vsyncpa [#allocation4 + $0x1], 0 }
   0x9   :  { %22 = vsyncpa [#allocation6], 0 }
   0xa   :  { %24 = vsyncpa [#allocation6 + $0x1], 0  ;;  %s1890_s25 = smov 0   ;;  %s1892_s26 = smov 0  }
   0xb   :  { %s1894_s27 = smov 0   ;;  %s1896_s28 = smov 0  }
   0xc LB: > { %s1911_s29 = sadd.s32 4294967295, %s1810_s28   ;;  %s1461_s30 = sadd.s32 4294967294, %s1810_s28   ;;  %s1810_s28 = sphi %s1896_s28, %s2318_s28   ;;  %s1806_s27 = sphi %s1894_s27, %s2317_s27   ;;  %s1802_s26 = sphi %s1892_s26, %s2316_s26   ;;  %s1798_s25 = sphi %s1890_s25, %s2315_s25  }
   0xd   : > { %s1915_s14 = sadd.s32 1, %s1810_s28   ;;  %s294_s15 = sadd.s32 1, %s1806_s27 }
   0xe   : > { %s291_s16 = ssub.s32 %s1810_s28, %s1915_s14  ;;  %p304_p0 = scmp.ne.s32.totalorder %s1806_s27, %s1802_s26 }
   0xf   : > { %p292_p1 = scmp.eq.s32.totalorder %s291_s16, 0  ;;  %p305_p2 = scmp.eq.s32.totalorder %s1911_s29, 1 }
  0x10   : > { %p310_p3 = scmp.ne.s32.totalorder %s1802_s26, %s1798_s25  ;;  %p311_p4 = scmp.eq.s32.totalorder %s1461_s30, 1 }
  0x11   : > { %s1926_s17 = scalar_select %p292_p1, %s1806_s27, %s294_s15  }
  0x12   : > { %p1928_p5 = por %p305_p2, %p304_p0  ;;  %p1932_p6 = por %p311_p4, %p310_p3 }
  0x13   : > { %p1464_p7 = scmp.ge.s32.totalorder %s1810_s28, 1  ;;  %p395_p8 = scmp.lt.s32.totalorder %s1810_s28, 3 }
  0x15   : > { %p396_p9 = pnand %p1464_p7, %p395_p8 }
  0x16   : > { %p443_p10 = scmp.lt.s32.totalorder (!%p396_p9), %s1911_s29, 1  ;;  %s2299_s0 = sld [smem:[#allocation9_spill]] (!%p396_p9) }
  0x17   : > { %399 = sbr.rel (%p396_p9) target bundleno = 2872 (0xb38), region = 68  ;;  %s2300_s3 = sld [smem:[#allocation12_spill]] (!%p396_p9) }
  0x18   : > { %s2303_s1 = sld [smem:[#allocation10_spill]] (!%p396_p9)  ;;  %s1816_s15 = smov (!%p396_p9), 96  }
  0x19   : > { %s2304_s2 = sld [smem:[#allocation11_spill]] (!%p396_p9)  ;;  %s2140_s23 = sand.u32 (!%p396_p9), 1, %s1802_s26  }
  0x1a   : > { %s2311_s4 = sld [smem:[#allocation13_spill]] (!%p396_p9)  ;;  %s1344_s22 = scalar_lea.sflag (!%p396_p9), [#allocation6], %s2140_s23 }
  0x1b   : > { %s2312_s5 = sld [smem:[#allocation14_spill]] (!%p396_p9) }
  0x1c   : > { %s444_s20 = scalar_select %p443_p10, %s1911_s29, 1  ;;  %vm454_vm0 = vcmask 261120   ;;  %v1812_v9 = vmov 0.0   ;;  %vm1813_vm1 = vmmov 0   ;;  %v544_v11 = vlaneseq }
  0x1d   : > { %v1682_v8 = vld [vmem:[%s2300_s3 + $0x8] sm:$0xff]   ;;  %1540 = vmatprep.subr.bf16.mxu0 %v1812_v9  ;;  %1544 = vmatprep.mubr.msk.bf16.mxu0 %vm1813_vm1, %v1812_v9  ;;  %v1683_v10 = vld [vmem:[%s2300_s3] sm:$0xff]   ;;  %v1814_v16 = vmov 0   ;;  %vm609_vm8 = vcmask 64512   ;;  %vm697_vm14 = vcmask 1043456  }
  0x1e   : > { %s1467_s21 = sshll.u32 %s444_s20, 2  ;;  %1541 = vmatpush3.bf16.msra.mxu0 %v1682_v8  ;;  %1560 = vmatprep.subr.bf16.mxu1 %v1812_v9  ;;  %v1963_v12 = vand.u32 127, %v544_v11  ;;  %v553_v13 = vshrl.u32 %v544_v11, 7  ;;  %v1468_v23 = vld [vmem:[%s2303_s1] ss:$0 sm:$0xff]  ;;  %s2290_s1 = sshll.u32 %s1911_s29, 6 }
  0x1f   : > { %s446_s24 = scalar_lea.vmem %s2299_s0, %s1467_s21  ;;  %1542 = vmatprep.subr.bf16.mxu0 %v1812_v9  ;;  %1562 = vmatprep.mubr.msk.bf16.mxu1 %vm1813_vm1, %v1812_v9  ;;  %s1815_s21 = smov 64   ;;  %v1469_v25 = vld [vmem:[%s2304_s2] ss:$0 sm:$0xff] }
  0x20   : > { %v450_v0 = vld [vmem:[%s446_s24] sm:$0xf]  ;;  %v1965_v14 = vsub.s32 0, %v553_v13  ;;  %vm622_vm2 = vcmp.ge.s32.totalorder %v1963_v12, 8  ;;  %vm623_vm3 = vcmp.lt.s32.totalorder %v1963_v12, 16  ;;  %vm547_vm6 = vcmp.lt.s32.totalorder %v1963_v12, 8  ;;  %s1368_s20 = scalar_lea.hbm %s2288_s13, %s2290_s1 }
  0x21   : > { %v1943_v1 = vunpack.c.l.bf16 %v450_v0  ;;  %vm1969_vm4 = vmand %vm622_vm2, %vm623_vm3  ;;  %vm909_vm10 = vcmp.ge.s32.totalorder %v1963_v12, 24  ;;  %vm910_vm11 = vcmp.lt.s32.totalorder %v1963_v12, 32  ;;  %vm790_vm15 = vcmp.ge.s32.totalorder %v1963_v12, 16  ;;  %s1818_s0 = smov [#allocation5]  }
  0x22   : > { %1543 = vmatpush3.bf16.msra.mxu0 %v1683_v10  ;;  %vm625_vm5 = vmpackc.low %vm1969_vm4, %vm1969_vm4  ;;  %vm791_vm2 = vcmp.lt.s32.totalorder %v1963_v12, 24  ;;  %s1724_s2 = sshll.u32 %s1818_s0, 4  ;;  %s1725_s2 = int_to_ptr.vmem [resolvable:$false] %s1724_s2 }
  0x23   : > { %v455_v2 = vsel %vm454_vm0, %v1943_v1, 0.0  ;;  %1548 = vmatprep.subr.bf16.mxu0 %v1812_v9  ;;  %v627_v17 = vsel %vm625_vm5, 65537, %v1814_v16  ;;  %vm2002_vm7 = vmpackc.low %vm547_vm6, %vm547_vm6  ;;  %s1726_s3 = scalar_lea.vmem %s1725_s2, 128 }
  0x24   : > { %456 = vadd.xlane.f32.xlu0 %v455_v2  ;;  %v631_v18 = vrot.slane %v627_v17, %v1965_v14  ;;  %vm2032_vm12 = vmand %vm909_vm10, %vm910_vm11  ;;  %v551_v61 = vsel %vm2002_vm7, 65537, %v1814_v16 }
  0x25   : > { %vm912_vm13 = vmpackc.low %vm2032_vm12, %vm2032_vm12  ;;  %v555_v62 = vrot.slane %v551_v61, %v1965_v14 }
  0x26   : > { %v914_v52 = vsel %vm912_vm13, 65537, %v1814_v16  ;;  %vm2061_vm3 = vmand %vm790_vm15, %vm791_vm2 }
  0x27   : > { %v918_v53 = vrot.slane %v914_v52, %v1965_v14  ;;  %vm793_vm4 = vmpackc.low %vm2061_vm3, %vm2061_vm3 }
  0xad   : > { %v457_v3 = vpop.xlane.xlu0 %456 }
  0xae   : > { %v459_v4 = vmul.f32 0.03125, %v457_v3 }
  0xb0   : > { %v460_v5 = vsub.f32 %v1943_v1, %v459_v4 }
  0xb2   : > { %v461_v6 = vmul.f32 %v460_v5, %v460_v5 }
  0xb4   : > { %v462_v7 = vsel %vm454_vm0, %v461_v6, 0.0 }
  0xb5   : > { %463 = vadd.xlane.f32.xlu0 %v462_v7 }
  0xcb   : > { %632 = vrot.lane.b32.xlu0 %v631_v18, %s1815_s21 }
 0x13e   : > { %v464_v19 = vpop.xlane.xlu0 %463 }
 0x13f   : > { %v465_v20 = vmul.f32 0.03125, %v464_v19 }
 0x141   : > { %v466_v21 = vadd.f32 1e-05, %v465_v20 }
 0x142   : > { %v633_v48 = vpop.permute.xlu0 %632 }
 0x143   : > { %1696 = vrsqrt.f32 %v466_v21  ;;  %vm634_vm9 = vcmp.ne.s16.totalorder %v633_v48, 0 }
 0x150   : > { %v1697_v22 = vpop.eup %1696 }
 0x151   : > { %v468_v24 = vmul.f32 %v1697_v22, %v460_v5 }
 0x153   : > { %v475_v26 = vmul.f32 %v1468_v23, %v468_v24  ;;  %v795_v24 = vsel %vm793_vm4, 65537, %v1814_v16 }
 0x155   : > { %v482_v27 = vadd.f32 %v1469_v25, %v475_v26  ;;  %v799_v25 = vrot.slane %v795_v24, %v1965_v14 }
 0x157   : > { %v483_v28 = vpack.c.bf16 %v482_v27, %v482_v27 }
 0x159   : > { %1545 = vmatmul.mubr.msk.bf16.vlgmr.msra.gmra.mxu0 %vm454_vm0, %v483_v28 }
 0x15a   : > { %1550 = vmatprep.mubr.msk.bf16.mxu0 %vm1813_vm1, %v1812_v9 }
 0x219   : > { %v537_v29 = vpop.f32.mrf.mxu0 }
 0x21a   : > { %v1993_v30 = vpack.c.bf16 %v537_v29, %v537_v29 }
 0x21b   : > { %v1546_v31 = vpop.f32.mrf.mxu0 }
 0x21c   : > { %561 = vrot.lane.b32.xlu1 %v1993_v30, %s1816_s15  ;;  %v550_v37 = vsel %vm2002_vm7, %v1993_v30, 0  ;;  %v626_v38 = vsel %vm625_vm5, %v1993_v30, 0  ;;  %v635_v49 = vsel %vm634_vm9, %v1993_v30, 0  ;;  %v794_v5 = vsel %vm793_vm4, %v1993_v30, 0  ;;  %s2289_s15 = sshll.u32 %s2140_s23, 2 }
 0x21d   : > { %v540_v32 = vpop.f32.mrf.mxu0  ;;  %v913_v6 = vsel %vm912_vm13, %v1993_v30, 0  ;;  %s2153_s16 = scalar_lea.vmem [#allocation5], %s2289_s15 }
 0x21f   : > { %v1547_v33 = vpop.f32.mrf.mxu0 }
 0x28e   : > { %v562_v34 = vpop.permute.xlu1 %561 }
 0x28f   : > { %v1997_v35 = vsel %vm454_vm0, %v562_v34, 0 }
 0x290   : > { %1549 = vmatpush3.bf16.xpose.msra.mxu0 %v1997_v35 }
 0x291   : > { %1554 = vmatprep.subr.bf16.mxu0 %v1812_v9 }
 0x297   : > { %1551 = vmatmul.mubr.msk.bf16.vlgmr.msra.gmra.mxu0 %vm454_vm0, %v550_v37 }
 0x298   : > { %1555 = vmatpush3.bf16.xpose.msra.mxu0 %v1997_v35  ;;  %1556 = vmatprep.mubr.msk.bf16.mxu0 %vm1813_vm1, %v1812_v9 }
 0x299   : > { %1566 = vmatprep.subr.bf16.mxu0 %v1812_v9 }
 0x29f   : > { %1557 = vmatmul.mubr.msk.bf16.vlgmr.msra.gmra.mxu0 %vm454_vm0, %v626_v38 }
 0x2a0   : > { %1568 = vmatprep.mubr.msk.bf16.mxu0 %vm1813_vm1, %v1812_v9 }
 0x357   : > { %v2023_v39 = vpop.f32.mrf.mxu0 }
 0x358   : > { %v610_v50 = vsel %vm609_vm8, %v2023_v39, -inf }
 0x359   : > { %v1552_v40 = vpop.f32.mrf.mxu0 }
 0x35b   : > { %v606_v41 = vpop.f32.mrf.mxu0 }
 0x35d   : > { %v1553_v42 = vpop.f32.mrf.mxu0 }
 0x35f   : > { %v673_v43 = vpop.f32.mrf.mxu0 }
 0x360   : > { %v679_v44 = vsel %vm609_vm8, %v673_v43, -inf }
 0x361   : > { %680 = vmax.xlane.f32.xlu1 %v679_v44  ;;  %v1558_v45 = vpop.f32.mrf.mxu0 }
 0x363   : > { %v676_v46 = vpop.f32.mrf.mxu0 }
 0x365   : > { %v1559_v47 = vpop.f32.mrf.mxu0 }
 0x372   : > { %692 = vrot.lane.b32.xlu1 %v635_v49, %s1815_s21 }
 0x396   : > { %611 = vmax.xlane.f32.xlu1 %v610_v50 }
 0x3a7   : > { %919 = vrot.lane.b32.xlu1 %v918_v53, %s1815_s21 }
 0x3ea   : > { %v681_v54 = vpop.xlane.xlu1 %680 }
 0x3eb   : > { %v682_v55 = vsub.f32 %v673_v43, %v681_v54 }
 0x3ed   : > { %v683_v56 = vmul.f32 1.442695, %v682_v55 }
 0x3ee   : > { %v693_v57 = vpop.permute.xlu1 %692 }
 0x3ef   : > { %1698 = vpow2.f32 %v683_v56  ;;  %v699_v58 = vsel %vm697_vm14, %v693_v57, 0 }
 0x3f0   : > { %1561 = vmatpush3.bf16.msra.mxu1 %v699_v58 }
 0x3f1   : > { %1572 = vmatprep.subr.bf16.mxu1 %v1812_v9 }
 0x3fc   : > { %v1699_v59 = vpop.eup %1698 }
 0x3fd   : > { %v685_v60 = vsel %vm609_vm8, %v1699_v59, 0.0 }
 0x3fe   : > { %686 = vadd.xlane.f32.xlu0 %v685_v60 }
 0x414   : > { %556 = vrot.lane.b32.xlu0 %v555_v62, %s1815_s21 }
 0x41f   : > { %v612_v26 = vpop.xlane.xlu1 %611 }
 0x420   : > { %v613_v27 = vsub.f32 %v2023_v39, %v612_v26 }
 0x422   : > { %v614_v28 = vmul.f32 1.442695, %v613_v27 }
 0x423   : > { %v920_v44 = vpop.permute.xlu1 %919 }
 0x424   : > { %vm921_vm7 = vcmp.ne.s16.totalorder %v920_v44, 0 }
 0x425   : > { %v922_v45 = vsel %vm921_vm7, %v1993_v30, 0 }
 0x487   : > { %v687_v63 = vpop.xlane.xlu0 %686 }
 0x488   : > { %1700 = vrcp.f32 %v687_v63  ;;  %v1684_v63 = vld [vmem:[%s2311_s4 + $0x8] sm:$0xff]  }
 0x489   : > { %1702 = vpow2.f32 %v614_v28 }
 0x48b   : > { %v557_v32 = vpop.permute.xlu0 %556 }
 0x48c   : > { %vm558_vm5 = vcmp.ne.s16.totalorder %v557_v32, 0 }
 0x48d   : > { %v559_v33 = vsel %vm558_vm5, %v1993_v30, 0 }
 0x495   : > { %v1701_v0 = vpop.eup %1700 }
 0x496   : > { %v689_v2 = vmul.f32 %v1701_v0, %v1699_v59  ;;  %v1703_v29 = vpop.eup %1702  ;;  %v1685_v0 = vld [vmem:[%s2311_s4] sm:$0xff]  }
 0x497   : > { %v616_v31 = vsel %vm609_vm8, %v1703_v29, 0.0 }
 0x498   : > { %v690_v3 = vpack.c.bf16 %v689_v2, %v689_v2 }
 0x49a   : > { %1563 = vmatmul.mubr.msk.bf16.vlgmr.msra.gmra.mxu1 %vm609_vm8, %v690_v3 }
 0x49b   : > { %1573 = vmatpush3.bf16.xpose.msra.mxu1 %v1997_v35  ;;  %1574 = vmatprep.mubr.msk.bf16.mxu1 %vm1813_vm1, %v1812_v9 }
 0x49c   : > { %1584 = vmatprep.subr.bf16.mxu1 %v1812_v9 }
 0x4a2   : > { %1575 = vmatmul.mubr.msk.bf16.vlgmr.msra.gmra.mxu1 %vm454_vm0, %v794_v5 }
 0x4a3   : > { %1585 = vmatpush3.bf16.xpose.msra.mxu1 %v1997_v35  ;;  %1586 = vmatprep.mubr.msk.bf16.mxu1 %vm1813_vm1, %v1812_v9 }
 0x4a4   : > { %1596 = vmatprep.subr.bf16.mxu1 %v1812_v9 }
 0x4aa   : > { %1587 = vmatmul.mubr.msk.bf16.vlgmr.msra.gmra.mxu1 %vm454_vm0, %v913_v6 }
 0x4ab   : > { %1600 = vmatprep.mubr.msk.bf16.mxu1 %vm1813_vm1, %v1812_v9  ;;  %1597 = vmatpush3.bf16.msra.mxu1 %v1684_v63 }
 0x4ac   : > { %1598 = vmatprep.subr.bf16.mxu1 %v1812_v9 }
 0x4af   : > { %1599 = vmatpush3.bf16.msra.mxu1 %v1685_v0 }
 0x4b0   : > { %1612 = vmatprep.subr.bf16.mxu1 %v1812_v9 }
 0x55a   : > { %v2089_v7 = vpop.f32.mrf.mxu1 }
 0x55c   : > { %v1564_v8 = vpop.f32.mrf.mxu1 }
 0x55e   : > { %v738_v10 = vpop.f32.mrf.mxu1 }
 0x560   : > { %v1565_v11 = vpop.f32.mrf.mxu1 }
 0x562   : > { %v841_v12 = vpop.f32.mrf.mxu1 }
 0x563   : > { %v847_v13 = vsel %vm609_vm8, %v841_v12, -inf }
 0x564   : > { %848 = vmax.xlane.f32.xlu0 %v847_v13  ;;  %v1576_v15 = vpop.f32.mrf.mxu1 }
 0x566   : > { %v844_v17 = vpop.f32.mrf.mxu1 }
 0x568   : > { %v1577_v18 = vpop.f32.mrf.mxu1 }
 0x56a   : > { %v960_v19 = vpop.f32.mrf.mxu1 }
 0x56b   : > { %v966_v20 = vsel %vm609_vm8, %v960_v19, -inf }
 0x56c   : > { %967 = vmax.xlane.f32.xlu0 %v966_v20  ;;  %v1588_v21 = vpop.f32.mrf.mxu1 }
 0x56e   : > { %v963_v22 = vpop.f32.mrf.mxu1 }
 0x570   : > { %v1589_v23 = vpop.f32.mrf.mxu1 }
 0x582   : > { %800 = vrot.lane.b32.xlu0 %v799_v25, %s1815_s21 }
 0x5a1   : > { %617 = vadd.xlane.f32.xlu0 %v616_v31 }
 0x5b7   : > { %742 = vrot.lane.b32.xlu0 %v559_v33, %s1815_s21 }
 0x5ed   : > { %v849_v16 = vpop.xlane.xlu0 %848 }
 0x5ee   : > { %v850_v34 = vsub.f32 %v841_v12, %v849_v16 }
 0x5f0   : > { %v851_v14 = vmul.f32 1.442695, %v850_v34 }
 0x5f2   : > { %1704 = vpow2.f32 %v851_v14  ;;  %v1686_v14 = vld [vmem:[%s2283_s8 + $0x8] sm:$0xff]  }
 0x5f5   : > { %v968_v35 = vpop.xlane.xlu0 %967 }
 0x5f6   : > { %v969_v36 = vsub.f32 %v960_v19, %v968_v35  ;;  %v1687_v35 = vld [vmem:[%s2283_s8] sm:$0xff]  }
 0x5f8   : > { %v970_v37 = vmul.f32 1.442695, %v969_v36 }
 0x5f9   : > { %v801_v42 = vpop.permute.xlu0 %800 }
 0x5fa   : > { %1706 = vpow2.f32 %v970_v37  ;;  %vm802_vm6 = vcmp.ne.s16.totalorder %v801_v42, 0  ;;  %v1486_v42 = vld [vmem:[%s2282_s7] ss:$0 sm:$0xff] }
 0x5fb   : > { %v803_v43 = vsel %vm802_vm6, %v1993_v30, 0 }
 0x5ff   : > { %v1705_v38 = vpop.eup %1704 }
 0x600   : > { %v853_v39 = vsel %vm609_vm8, %v1705_v38, 0.0 }
 0x601   : > { %854 = vadd.xlane.f32.xlu1 %v853_v39 }
 0x607   : > { %v1707_v40 = vpop.eup %1706 }
 0x608   : > { %v972_v41 = vsel %vm609_vm8, %v1707_v40, 0.0 }
 0x609   : > { %973 = vadd.xlane.f32.xlu0 %v972_v41 }
 0x612   : > { %860 = vrot.lane.b32.xlu1 %v803_v43, %s1815_s21 }
 0x61f   : > { %979 = vrot.lane.b32.xlu0 %v922_v45, %s1815_s21  ;;  %s1370_s21 = sshll.u32 %s2153_s16, 4  ;;  %s1371_s21 = int_to_ptr.vmem [resolvable:$true] %s1370_s21 }
 0x620   : > { %s1720_s24 = scalar_lea.vmem %s1371_s21, 64  ;;  %p1727_p0 = scmp.lt.s32.totalorder %s1371_s21, %s1725_s2 }
 0x621   : > { %p1721_p11 = scmp.ne.s32.totalorder %s1371_s21, %s1720_s24  ;;  %p1728_p1 = scmp.lt.s32.totalorder %s1726_s3, %s1720_s24 }
 0x623   : > { %p1722_p12 = pnand %p1721_p11, %p1928_p5  ;;  %p1729_p2 = por %p1728_p1, %p1727_p0 }
 0x625   : > { %p1723_p13 = pneg %p1722_p12 }
 0x627   : > { %p1730_p3 = pnand %p1729_p2, %p1723_p13 }
 0x62a   : > { %v618_v46 = vpop.xlane.xlu0 %617 }
 0x62b   : > { %1708 = vrcp.f32 %v618_v46  ;;  %v1688_v46 = vld [vmem:[%s2285_s10 + $0x38] sm:$0xff]  }
 0x62e   : > { %v743_v47 = vpop.permute.xlu0 %742 }
 0x62f   : > { %v748_v48 = vsel %vm697_vm14, %v743_v47, 0  ;;  %v1689_v47 = vld [vmem:[%s2285_s10 + $0x30] sm:$0xff]  }
 0x630   : > { %1567 = vmatpush3.bf16.msra.mxu0 %v748_v48  ;;  %v1690_v48 = vld [vmem:[%s2285_s10 + $0x28] sm:$0xff]  }
 0x631   : > { %1578 = vmatprep.subr.bf16.mxu0 %v1812_v9 }
 0x638   : > { %v1709_v49 = vpop.eup %1708 }
 0x639   : > { %v620_v50 = vmul.f32 %v1709_v49, %v1703_v29  ;;  %v1691_v49 = vld [vmem:[%s2285_s10 + $0x20] sm:$0xff]  }
 0x63b   : > { %v621_v51 = vpack.c.bf16 %v620_v50, %v620_v50  ;;  %v1692_v50 = vld [vmem:[%s2285_s10 + $0x18] sm:$0xff]  }
 0x63d   : > { %1569 = vmatmul.mubr.msk.bf16.vlgmr.msra.gmra.mxu0 %vm609_vm8, %v621_v51  ;;  %v1693_v51 = vld [vmem:[%s2285_s10 + $0x10] sm:$0xff]  }
 0x63e   : > { %1580 = vmatprep.mubr.msk.bf16.mxu0 %vm1813_vm1, %v1812_v9 }
 0x68a   : > { %v855_v52 = vpop.xlane.xlu1 %854 }
 0x68b   : > { %1710 = vrcp.f32 %v855_v52  ;;  %v1694_v52 = vld [vmem:[%s2285_s10 + $0x8] sm:$0xff]  }
 0x68e   : > { %v861_v30 = vpop.permute.xlu1 %860 }
 0x68f   : > { %v866_v53 = vsel %vm697_vm14, %v861_v30, 0  ;;  %v1695_v30 = vld [vmem:[%s2285_s10] sm:$0xff]  }
 0x690   : > { %1579 = vmatpush3.bf16.msra.mxu0 %v866_v53  ;;  %v1487_v53 = vld [vmem:[%s2284_s9] ss:$0 sm:$0xff] }
 0x691   : > { %1590 = vmatprep.subr.bf16.mxu0 %v1812_v9 }
 0x692   : > { %v974_v54 = vpop.xlane.xlu0 %973 }
 0x693   : > { %1712 = vrcp.f32 %v974_v54 }
 0x696   : > { %v980_v57 = vpop.permute.xlu0 %979 }
 0x697   : > { %v985_v59 = vsel %vm697_vm14, %v980_v57, 0 }
 0x698   : > { %v1711_v55 = vpop.eup %1710 }
 0x699   : > { %v857_v56 = vmul.f32 %v1711_v55, %v1705_v38 }
 0x69b   : > { %v858_v58 = vpack.c.bf16 %v857_v56, %v857_v56 }
 0x69d   : > { %1581 = vmatmul.mubr.msk.bf16.vlgmr.msra.gmra.mxu0 %vm609_vm8, %v858_v58 }
 0x69e   : > { %1591 = vmatpush3.bf16.msra.mxu0 %v985_v59  ;;  %1592 = vmatprep.mubr.msk.bf16.mxu0 %vm1813_vm1, %v1812_v9 }
 0x69f   : > { %1604 = vmatprep.subr.bf16.mxu0 %v1812_v9 }
 0x6a0   : > { %v1713_v60 = vpop.eup %1712 }
 0x6a1   : > { %v976_v61 = vmul.f32 %v1713_v60, %v1707_v40  ;;  %v1485_v40 = vld [vmem:[%s2281_s6] ss:$0 sm:$0xff] }
 0x6a3   : > { %v977_v62 = vpack.c.bf16 %v976_v61, %v976_v61 }
 0x6a5   : > { %1593 = vmatmul.mubr.msk.bf16.vlgmr.msra.gmra.mxu0 %vm609_vm8, %v977_v62  ;;  %vm1029_vm8 = vcmask 257024  }
 0x6a6   : > { %1608 = vmatprep.mubr.msk.bf16.mxu0 %vm1813_vm1, %v1812_v9  ;;  %1605 = vmatpush3.bf16.msra.mxu0 %v1686_v14 }
 0x6a7   : > { %1606 = vmatprep.subr.bf16.mxu0 %v1812_v9 }
 0x6aa   : > { %1607 = vmatpush3.bf16.msra.mxu0 %v1687_v35 }
 0x6fd   : > { %v784_v2 = vpop.f32.mrf.mxu0 }
 0x6fe   : > { %v785_v11 = vadd.f32 %v784_v2, %v2089_v7  ;;  %v1481_v7 = vld [vmem:[%s2312_s5] ss:$0 sm:$0xff] }
 0x6ff   : > { %v1570_v3 = vpop.f32.mrf.mxu0 }
 0x701   : > { %v787_v4 = vpop.f32.mrf.mxu0 }
 0x703   : > { %v1571_v5 = vpop.f32.mrf.mxu0 }
 0x75d   : > { %v902_v6 = vpop.f32.mrf.mxu0 }
 0x75e   : > { %v908_v13 = vadd.f32 %v902_v6, %v785_v11 }
 0x75f   : > { %v1582_v8 = vpop.f32.mrf.mxu0 }
 0x761   : > { %v905_v10 = vpop.f32.mrf.mxu0 }
 0x763   : > { %v1583_v12 = vpop.f32.mrf.mxu0 }
 0x765   : > { %v1021_v15 = vpop.f32.mrf.mxu0 }
 0x766   : > { %v1027_v17 = vadd.f32 %v1021_v15, %v908_v13 }
 0x767   : > { %v1594_v18 = vpop.f32.mrf.mxu0 }
 0x768   : > { %v1028_v19 = vpack.c.bf16 %v1027_v17, %v1027_v17 }
 0x769   : > { %v1024_v20 = vpop.f32.mrf.mxu0 }
 0x76a   : > { %1030 = vst.msk [vmem:[#allocation2] sm:$0xf] %vm1029_vm8, %v1028_v19  ;;  %v1817_v19 = vmov -1.0  }
 0x76b   : > { %v1595_v21 = vpop.f32.mrf.mxu0 }
 0x771   : > { %v1031_v22 = vld [vmem:[#allocation2] sm:$0xf] }
 0x772   : > { %1601 = vmatmul.mubr.msk.bf16.vlgmr.msra.gmra.mxu1 %vm454_vm0, %v1031_v22 }
 0x773   : > { %1628 = vmatprep.mubr.msk.bf16.mxu1 %vm1813_vm1, %v1812_v9  ;;  %1613 = vmatpush3.bf16.msra.mxu1 %v1688_v46 }
 0x774   : > { %1614 = vmatprep.subr.bf16.mxu1 %v1812_v9 }
 0x777   : > { %1615 = vmatpush3.bf16.msra.mxu1 %v1689_v47 }
 0x778   : > { %1616 = vmatprep.subr.bf16.mxu1 %v1812_v9 }
 0x77b   : > { %1617 = vmatpush3.bf16.msra.mxu1 %v1690_v48 }
 0x77c   : > { %1618 = vmatprep.subr.bf16.mxu1 %v1812_v9 }
 0x77f   : > { %1619 = vmatpush3.bf16.msra.mxu1 %v1691_v49 }
 0x780   : > { %1620 = vmatprep.subr.bf16.mxu1 %v1812_v9 }
 0x783   : > { %1621 = vmatpush3.bf16.msra.mxu1 %v1692_v50 }
 0x784   : > { %1622 = vmatprep.subr.bf16.mxu1 %v1812_v9 }
 0x787   : > { %1623 = vmatpush3.bf16.msra.mxu1 %v1693_v51 }
 0x788   : > { %1624 = vmatprep.subr.bf16.mxu1 %v1812_v9 }
 0x78b   : > { %1625 = vmatpush3.bf16.msra.mxu1 %v1694_v52 }
 0x78c   : > { %1626 = vmatprep.subr.bf16.mxu1 %v1812_v9 }
 0x78f   : > { %1627 = vmatpush3.bf16.msra.mxu1 %v1695_v30 }
 0x832   : > { %v1092_v23 = vpop.f32.mrf.mxu1 }
 0x833   : > { %v1093_v24 = vadd.f32 %v1481_v7, %v1092_v23 }
 0x834   : > { %v1602_v25 = vpop.f32.mrf.mxu1 }
 0x835   : > { %v1098_v26 = vpack.c.bf16 %v1093_v24, %v1093_v24  ;;  %v2147_v27 = vadd.f32 %v1093_v24, %v1943_v1 }
 0x836   : > { %v1095_v28 = vpop.f32.mrf.mxu1 }
 0x837   : > { %v1103_v29 = vsel %vm454_vm0, %v2147_v27, 0.0  ;;  %1099 = vst.msk [vmem:[%s2153_s16] sm:$0xf] %vm1029_vm8, %v1098_v26 }
 0x838   : > { %1104 = vadd.xlane.f32.xlu0 %v1103_v29  ;;  %v1603_v31 = vpop.f32.mrf.mxu1 }
 0x8c1   : > { %v1105_v32 = vpop.xlane.xlu0 %1104 }
 0x8c2   : > { %v1106_v33 = vmul.f32 0.03125, %v1105_v32 }
 0x8c4   : > { %v1107_v16 = vsub.f32 %v2147_v27, %v1106_v33 }
 0x8c6   : > { %v1108_v34 = vmul.f32 %v1107_v16, %v1107_v16 }
 0x8c8   : > { %v1109_v1 = vsel %vm454_vm0, %v1108_v34, 0.0 }
 0x8c9   : > { %1110 = vadd.xlane.f32.xlu1 %v1109_v1 }
 0x952   : > { %v1111_v36 = vpop.xlane.xlu1 %1110 }
 0x953   : > { %v1112_v37 = vmul.f32 0.03125, %v1111_v36 }
 0x955   : > { %v1113_v38 = vadd.f32 1e-05, %v1112_v37 }
 0x957   : > { %1714 = vrsqrt.f32 %v1113_v38 }
 0x964   : > { %v1715_v39 = vpop.eup %1714 }
 0x965   : > { %v1115_v41 = vmul.f32 %v1715_v39, %v1107_v16 }
 0x967   : > { %v1122_v43 = vmul.f32 %v1485_v40, %v1115_v41 }
 0x969   : > { %v1129_v44 = vadd.f32 %v1486_v42, %v1122_v43 }
 0x96b   : > { %v1130_v45 = vpack.c.bf16 %v1129_v44, %v1129_v44 }
 0x96d   : > { %1609 = vmatmul.mubr.msk.bf16.vlgmr.msra.gmra.mxu0 %vm454_vm0, %v1130_v45 }
 0xa2d   : > { %v1191_v54 = vpop.f32.mrf.mxu0 }
 0xa2e   : > { %v1192_v55 = vadd.f32 %v1487_v53, %v1191_v54 }
 0xa2f   : > { %v1610_v56 = vpop.f32.mrf.mxu0 }
 0xa30   : > { %v1198_v57 = vmul.f32 0.70710677, %v1192_v55  ;;  %v1197_v22 = vmul.f32 0.5, %v1192_v55 }
 0xa31   : > { %v1194_v58 = vpop.f32.mrf.mxu0 }
 0xa32   : > { %v1201_v59 = vand.u32 2147483647, %v1198_v57  ;;  %vm1199_vm0 = vcmp.ge.f32.partialorder %v1198_v57, 0.0 }
 0xa33   : > { %v1611_v60 = vpop.f32.mrf.mxu0  ;;  %v1200_v20 = vsel %vm1199_vm0, 1.0, %v1817_v19 }
 0xa34   : > { %v1202_v61 = vmul.f32 0.3275911, %v1201_v59  ;;  %v1214_v9 = vsub.f32 0.0, %v1201_v59 }
 0xa36   : > { %v1203_v62 = vadd.f32 1.0, %v1202_v61  ;;  %v1215_v63 = vmul.f32 %v1214_v9, %v1201_v59 }
 0xa38   : > { %1716 = vrcp.f32 %v1203_v62  ;;  %v1216_v3 = vmul.f32 1.442695, %v1215_v63 }
 0xa3a   : > { %1718 = vpow2.f32 %v1216_v3 }
 0xa45   : > { %v1717_v0 = vpop.eup %1716 }
 0xa46   : > { %v1205_v2 = vmul.f32 1.0614054, %v1717_v0 }
 0xa47   : > { %v1719_v15 = vpop.eup %1718 }
 0xa48   : > { %v1206_v4 = vadd.f32 -1.4531521, %v1205_v2 }
 0xa4a   : > { %v1207_v5 = vmul.f32 %v1717_v0, %v1206_v4 }
 0xa4c   : > { %v1208_v6 = vadd.f32 1.4214138, %v1207_v5 }
 0xa4e   : > { %v1209_v8 = vmul.f32 %v1717_v0, %v1208_v6 }
 0xa50   : > { %v1210_v10 = vadd.f32 -0.28449672, %v1209_v8 }
 0xa52   : > { %v1211_v11 = vmul.f32 %v1717_v0, %v1210_v10 }
 0xa54   : > { %v1212_v12 = vadd.f32 0.2548296, %v1211_v11 }
 0xa56   : > { %v1213_v13 = vmul.f32 %v1717_v0, %v1212_v12 }
 0xa58   : > { %v1218_v17 = vmul.f32 %v1719_v15, %v1213_v13 }
 0xa5a   : > { %v1219_v18 = vsub.f32 1.0, %v1218_v17 }
 0xa5c   : > { %v1220_v21 = vmul.f32 %v1219_v18, %v1200_v20 }
 0xa5e   : > { %v1221_v7 = vadd.f32 1.0, %v1220_v21 }
 0xa60   : > { %v1222_v23 = vmul.f32 %v1221_v7, %v1197_v22 }
 0xa62   : > { %v1223_v24 = vpack.c.bf16 %v1222_v23, %v1222_v23 }
 0xa64   : > { %1629 = vmatmul.mubr.bf16.vlgmr.msra.gmra.mxu1 %v1223_v24 }
 0xa65   : > { %1733 = shalt.err (!%p1730_p3)
}
 0xa66   : > { %s1734_s4 = scalar_lea.hbm %s1368_s20, 64  ;;  %s1738_s30 = scalar_lea.hbm %s2288_s13, 128 }
 0xa67   : > { %p1735_p4 = scmp.ne.s32.totalorder %s1368_s20, %s1734_s4  ;;  %p1739_p9 = scmp.lt.s32.totalorder %s1368_s20, %s2288_s13 }
 0xa68   : > { %p1740_p10 = scmp.lt.s32.totalorder %s1738_s30, %s1734_s4 }
 0xa69   : > { %p1736_p7 = pnand %p1735_p4, %p1928_p5 }
 0xa6a   : > { %p1741_p11 = por %p1740_p10, %p1739_p9 }
 0xa6b   : > { %p1737_p8 = pneg %p1736_p7 }
 0xa6d   : > { %p1742_p12 = pnand %p1741_p11, %p1737_p8 }
 0xa6f   : > { %1745 = shalt.err (!%p1742_p12)
}
 0xa70   : > { %1633 = dma.vmem_to_hbm [thread:$0]  (%p1928_p5), %s1371_s21, 64, %s1368_s20, %s1344_s22   ;;  %v1491_v25 = vld [vmem:[%s2286_s11] ss:$0 sm:$0xff] }
 0xa71   : > { %s2313_s5 = sshll.u32 %s2140_s23, 2  ;;  %s2314_s24 = sshll.u32 %s1911_s29, 6 }
 0xa72   : > { %s435_s1 = scalar_lea.vmem [#allocation3], %s2313_s5  ;;  %s2238_s20 = scalar_lea.hbm %s2287_s12, %s2314_s24 }
 0xa73   : > { %s1357_s4 = sshll.u32 %s435_s1, 4  ;;  %s1339_s21 = scalar_lea.sflag [#allocation4], %s2140_s23  ;;  %s1358_s4 = int_to_ptr.vmem [resolvable:$true] %s1357_s4 }
 0xa74   : > { %s1746_s22 = scalar_lea.vmem %s1358_s4, 64  ;;  %s1819_s15 = smov [#allocation3]  }
 0xa75   : > { %p1747_p13 = scmp.ne.s32.totalorder %s1358_s4, %s1746_s22  ;;  %s1750_s30 = sshll.u32 %s1819_s15, 4  ;;  %s1751_s30 = int_to_ptr.vmem [resolvable:$false] %s1750_s30 }
 0xa76   : > { %s1752_s2 = scalar_lea.vmem %s1751_s30, 128  ;;  %p1753_p2 = scmp.lt.s32.totalorder %s1358_s4, %s1751_s30 }
 0xa77   : > { %p1748_p0 = pnand %p1747_p13, %p1928_p5  ;;  %p1754_p3 = scmp.lt.s32.totalorder %s1752_s2, %s1746_s22 }
 0xa79   : > { %p1749_p1 = pneg %p1748_p0  ;;  %p1755_p4 = por %p1754_p3, %p1753_p2 }
 0xa7b   : > { %p1756_p7 = pnand %p1755_p4, %p1749_p1 }
 0xb24   : > { %v1329_v26 = vpop.f32.mrf.mxu1 }
 0xb25   : > { %v1330_v28 = vadd.f32 %v1491_v25, %v1329_v26 }
 0xb26   : > { %v1630_v29 = vpop.f32.mrf.mxu1 }
 0xb27   : > { %v1335_v31 = vadd.f32 %v1330_v28, %v2147_v27 }
 0xb28   : > { %v1332_v32 = vpop.f32.mrf.mxu1 }
 0xb29   : > { %v1336_v33 = vpack.c.bf16 %v1335_v31, %v1335_v31 }
 0xb2a   : > { %v1631_v16 = vpop.f32.mrf.mxu1 }
 0xb2b   : > { %1337 = vst.msk [vmem:[%s435_s1] sm:$0xf] %vm1029_vm8, %v1336_v33 }
 0xb2c   : > { %1759 = shalt.err (!%p1756_p7)
}
 0xb2d   : > { %s1760_s29 = scalar_lea.hbm %s2238_s20, 64  ;;  %s1764_s5 = scalar_lea.hbm %s2287_s12, 128 }
 0xb2e   : > { %p1761_p8 = scmp.ne.s32.totalorder %s2238_s20, %s1760_s29  ;;  %p1765_p11 = scmp.lt.s32.totalorder %s2238_s20, %s2287_s12 }
 0xb2f   : > { %p1766_p12 = scmp.lt.s32.totalorder %s1764_s5, %s1760_s29 }
 0xb30   : > { %p1762_p9 = pnand %p1761_p8, %p1928_p5 }
 0xb31   : > { %p1767_p13 = por %p1766_p12, %p1765_p11 }
 0xb32   : > { %p1763_p10 = pneg %p1762_p9 }
 0xb34   : > { %p1768_p0 = pnand %p1767_p13, %p1763_p10 }
 0xb36   : > { %1771 = shalt.err (!%p1768_p0)
}
 0xb37   : > { %1632 = dma.vmem_to_hbm [thread:$0]  (%p1928_p5), %s1358_s4, 64, %s2238_s20, %s1339_s21  }
 0xb38 PF: > { %p1643_p1 = scmp.ge.s32.totalorder %s1810_s28, 2  ;;  %s1382_s0 = sand.u32 1, %s1798_s25  }
 0xb39   : > { %s1383_s16 = scalar_lea.sflag [#allocation4], %s1382_s0 }
 0xb3a   : > { %p1637_p2 = pnand %p1643_p1, %p1932_p6 }
 0xb3c   : > { %p1638_p3 = pneg %p1637_p2 }
 0xb3e   : > { %1789 = dma.done.wait (%p1638_p3), %s1383_s16, 64  }
 0xb3f   : > { %1791 = vsyncadd (%p1638_p3), %s1383_s16, 4294967232  ;;  %s1392_s22 = scalar_lea.sflag [#allocation6], %s1382_s0 }
 0xb40   : > { %1793 = dma.done.wait (%p1638_p3), %s1392_s22, 64  }
 0xb41   : > { %1795 = vsyncadd (%p1638_p3), %s1392_s22, 4294967232  ;;  %p27_p5 = scmp.ge.s32.totalorder %s1915_s14, 4   ;;  %s2315_s25 = smov %s1802_s26 }
 0xb42   : > { %s2316_s26 = smov %s1806_s27  ;;  %s2317_s27 = smov %s1926_s17 }
 0xb43   : > { %s2318_s28 = smov %s1915_s14  ;;  %29 = sbr.rel (!%p27_p5) target bundleno = 12 (0xc), region = 120 }
 0xb48   :  { %1397 = vsyncpa [#allocation4], 1 }
 0xb49   :  { %1399 = vsyncpa [#allocation4 + $0x1], 1 }
 0xb4a   :  { %1400 = vsyncpa [#allocation6], 1 }
 0xb4b   :  { %1402 = vsyncpa [#allocation6 + $0x1], 1 }

</bundles_post_ra>
